<compile_context>
chip_gen: v7x
topology: tpu7x:2x2x1
jax: 0.10.0
libtpu: 0.0.40
codegen_flags: <defaults>
</compile_context>

<pallas_src>
import functools

import jax
import jax.numpy as jnp
from jax.experimental import pallas as pl
from jax.experimental.pallas import tpu as pltpu


def _round_up(x, m):
    return ((x + m - 1) // m) * m


def _block_extractor_kernel(src_ref, coord_ref, out_ref, *, C, HS, WS):
    """One (batch, output-pixel tile) grid step.

    src_ref:   (1, C*HS, WS)  source rows; x (WS) is the stage-1 contraction axis
    coord_ref: (1, 2, TN)     row 0 = dy, row 1 = dx for this output tile
    out_ref:   (1, C, TN)     lane-dense output tile
    """
    TN = out_ref.shape[-1]

    coords = coord_ref[0].astype(jnp.float32)            # (2, TN)
    # Guard extreme/garbage flow values before floor -> int32 (results for
    # fully clamped samples are identical, so semantics are preserved).
    dy = jnp.clip(coords[0:1, :], -1.0, float(HS))        # (1, TN)
    dx = jnp.clip(coords[1:2, :], -1.0, float(WS))        # (1, TN)

    fy = jnp.floor(dy)
    fx = jnp.floor(dx)
    iy = fy.astype(jnp.int32)
    ix = fx.astype(jnp.int32)
    yT = jnp.clip(iy, 0, HS - 1)
    yB = jnp.clip(iy + 1, 0, HS - 1)
    xL = jnp.clip(ix, 0, WS - 1)
    xR = jnp.clip(ix + 1, 0, WS - 1)
    wyB = dy - fy
    wyT = 1.0 - wyB
    wxR = dx - fx
    wxL = 1.0 - wxR

    # Separable one-hot weight matrices (<= 2 nonzeros per column each).
    # Coinciding clamped corners correctly accumulate (sum) their weights.
    wiota = jax.lax.broadcasted_iota(jnp.int32, (WS, TN), 0)
    ox = (jnp.where(wiota == xL, wxL, 0.0)
          + jnp.where(wiota == xR, wxR, 0.0))             # (WS, TN)
    hiota = jax.lax.broadcasted_iota(jnp.int32, (HS, TN), 0)
    oy = (jnp.where(hiota == yT, wyT, 0.0)
          + jnp.where(hiota == yB, wyB, 0.0))             # (HS, TN)

    # Stage 1 (MXU): horizontal bilinear sample for every (channel, row):
    #   tmp[(c,h), n] = sum_w src[c,h,w] * ox[w,n]
    # Feed the MXU in bf16 when the source is already bf16; the build stays
    # f32 (ox/oy are tiny now) and accumulation is always f32.
    mxu_dtype = jnp.bfloat16 if src_ref.dtype == jnp.bfloat16 else jnp.float32
    src2d = src_ref[0].astype(mxu_dtype)                   # (C*HS, WS)
    tmp = jnp.dot(src2d, ox.astype(mxu_dtype),
                  preferred_element_type=jnp.float32)      # (C*HS, TN)

    # Stage 2 (VPU + sublane reduce): vertical combine with the y weights:
    #   out[c, n] = sum_h tmp[c, h, n] * oy[h, n]
    out = jnp.sum(tmp.reshape(C, HS, TN) * oy[None, :, :], axis=1)  # (C, TN)
    out_ref[0] = out.astype(out_ref.dtype)


def block_extractor(source, flow_field, kernel_size=3, tile_n=512):
    """source: (B, C, HS, WS), flow_field: (B, 2, HF, WF) -> (B, C, k*HF, k*WF)."""
    B, C, HS, WS = source.shape
    Bf, Df, HF, WF = flow_field.shape
    assert Df == 2 and Bf == B
    k = kernel_size
    Hout, Wout = k * HF, k * WF
    Nout = Hout * Wout

    # ---- wrapper-side prep (broadcast/reshape only; no gathers/transposes) --
    # Nearest upsample-by-k of the flow field, plus the per-pixel block offsets.
    fl = jnp.broadcast_to(
        flow_field.astype(jnp.float32).reshape(B, 2, HF, 1, WF, 1),
        (B, 2, HF, k, WF, k),
    ).reshape(B, 2, Hout, Wout)
    y = jnp.arange(Hout, dtype=jnp.int32)
    x = jnp.arange(Wout, dtype=jnp.int32)
    off_y = (y % k + y // k - k // 2).astype(jnp.float32)[:, None]   # (Hout, 1)
    off_x = (x % k + x // k - k // 2).astype(jnp.float32)[None, :]   # (1, Wout)
    dy = fl[:, 1] + off_y                                            # (B, Hout, Wout)
    dx = fl[:, 0] + off_x
    coords = jnp.stack([dy, dx], axis=1).reshape(B, 2, Nout)

    # ---- tile selection: minimize padded columns, keep tiles lane-dense -----
    tn_cap = max(_round_up(int(tile_n), 128), 128)
    nout_128 = _round_up(Nout, 128)
    if nout_128 <= max(tn_cap, 1024):
        # Small output: one tile, only pad to the next multiple of 128.
        TN, Nout_pad = nout_128, nout_128
    else:
        # Pick the multiple-of-128 tile <= tn_cap that minimizes total padding
        # (ties -> larger tile to amortize the ~0.35 us per-grid-step overhead).
        TN, Nout_pad = 128, _round_up(Nout, 128)
        for d in range(1, tn_cap // 128 + 1):
            tn = d * 128
            pad_total = _round_up(Nout, tn)
            if pad_total <= Nout_pad:
                TN, Nout_pad = tn, pad_total
    num_tiles = Nout_pad // TN

    if Nout_pad != Nout:
        # Padded coords are zeros -> valid clamped sample of pixel (0,0); the
        # padded output columns are sliced away below.
        coords = jnp.pad(coords, ((0, 0), (0, 0), (0, Nout_pad - Nout)))

    src_r = source.reshape(B, C * HS, WS)   # contiguous NCHW reshape (free)
    out_dtype = source.dtype
    itemsize = jnp.dtype(out_dtype).itemsize

    # ---- VMEM budget: real footprint + margin, capped by the chip's VMEM ----
    footprint = (
        2 * C * HS * WS * itemsize          # source slab (double-buffer bound)
        + 2 * 2 * TN * 4                    # coords tiles (double-buffered)
        + 2 * C * TN * itemsize             # output tiles (double-buffered)
        + 4 * TN * (2 * WS + 2 * HS + C * HS)   # ox/oy/iotas/tmp scratch (f32)
    )
    vmem_cap = 64 << 20
    try:
        vmem_cap = int(getattr(pltpu.get_tpu_info(), "vmem_capacity_bytes", vmem_cap))
    except Exception:
        pass
    vmem_limit = int(min(max(2 * footprint + (4 << 20), 32 << 20),
                         max(vmem_cap - (16 << 20), 32 << 20)))

    cost = pl.CostEstimate(
        flops=int(2 * B * C * HS * WS * Nout_pad        # stage-1 matmul
                  + 2 * B * C * HS * Nout_pad),         # stage-2 combine
        transcendentals=0,
        bytes_accessed=int(src_r.size * itemsize
                           + coords.size * 4
                           + B * C * Nout_pad * itemsize),
    )

    kern = functools.partial(_block_extractor_kernel, C=C, HS=HS, WS=WS)
    # TODO(synk): on v7x, consider pipeline_mode=pl.Buffered(1) on the source
    # slab spec (its index_map is constant across the tile axis) to avoid a
    # redundant double buffer for large C*HS*WS under the 64 MiB VMEM.
    out = pl.pallas_call(
        kern,
        out_shape=jax.ShapeDtypeStruct((B, C, Nout_pad), out_dtype),
        grid=(B, num_tiles),
        in_specs=[
            # Source slab stays VMEM-resident across the whole tile axis.
            pl.BlockSpec((1, C * HS, WS), lambda b, n: (b, 0, 0)),
            pl.BlockSpec((1, 2, TN), lambda b, n: (b, 0, n)),
        ],
        out_specs=pl.BlockSpec((1, C, TN), lambda b, n: (b, 0, n)),
        compiler_params=pltpu.CompilerParams(
            dimension_semantics=("parallel", "parallel"),
            vmem_limit_bytes=vmem_limit,
        ),
        cost_estimate=cost,
    )(src_r, coords)

    return out[:, :, :Nout].reshape(B, C, Hout, Wout)


def _reference(source, flow, k):
    """Pure-JAX reference matching the CUDA kernel semantics (for validation)."""
    B, C, HS, WS = source.shape
    _, _, HF, WF = flow.shape
    Hout, Wout = k * HF, k * WF
    yy, xx = jnp.meshgrid(jnp.arange(Hout), jnp.arange(Wout), indexing="ij")
    ys, xs = yy // k, xx // k
    yo, xo = yy % k, xx % k

    fx = flow[:, 0][:, ys, xs]  # (B, Hout, Wout)
    fy = flow[:, 1][:, ys, xs]
    dy = fy + (yo + ys - k // 2).astype(flow.dtype)
    dx = fx + (xo + xs - k // 2).astype(flow.dtype)

    fy_ = jnp.floor(dy)
    fx_ = jnp.floor(dx)
    yT = jnp.clip(fy_.astype(jnp.int32), 0, HS - 1)
    yB = jnp.clip(fy_.astype(jnp.int32) + 1, 0, HS - 1)
    xL = jnp.clip(fx_.astype(jnp.int32), 0, WS - 1)
    xR = jnp.clip(fx_.astype(jnp.int32) + 1, 0, WS - 1)
    wyB = dy - fy_
    wyT = 1.0 - wyB
    wxR = dx - fx_
    wxL = 1.0 - wxR

    def one_batch(src_b, yT, yB, xL, xR, wyT, wyB, wxL, wxR):
        g = lambda yi, xi: src_b[:, yi, xi]  # (C, Hout, Wout)
        return ((wyT * wxL) * g(yT, xL) + (wyT * wxR) * g(yT, xR)
                + (wyB * wxL) * g(yB, xL) + (wyB * wxR) * g(yB, xR))

    return jax.vmap(one_batch)(source, yT, yB, xL, xR, wyT, wyB, wxL, wxR)


if __name__ == "__main__":
    B, C, HS, WS = 2, 4, 16, 16
    HF, WF = 8, 8
    k = 3

    key = jax.random.PRNGKey(0)
    k1, k2 = jax.random.split(key)
    source = jax.random.normal(k1, (B, C, HS, WS), dtype=jnp.float32)
    # Flow values spanning a few pixels (including out-of-bounds to exercise clamping).
    flow_field = 4.0 * jax.random.normal(k2, (B, 2, HF, WF), dtype=jnp.float32)

    out = block_extractor(source, flow_field, kernel_size=k)
    out = jax.block_until_ready(out)
    assert out.shape == (B, C, k * HF, k * WF)
    assert out.dtype == source.dtype

    ref = _reference(source, flow_field, k)
    assert jnp.allclose(out, ref, atol=1e-4, rtol=1e-4), "mismatch vs reference"

    print("KERNEL_OK")
</pallas_src>

<mosaic_0001>
module attributes {stable_mosaic.version = 11 : i64} {
  func.func @_block_extractor_kernel(%arg0: i32, %arg1: i32, %arg2: memref<1x64x16xf32, #tpu.memory_space<vmem>>, %arg3: memref<1x2x640xf32, #tpu.memory_space<vmem>>, %arg4: memref<1x4x640xf32, #tpu.memory_space<vmem>>) attributes {dimension_semantics = [#tpu.dimension_semantics<parallel>, #tpu.dimension_semantics<parallel>], iteration_bounds = array<i64: 2, 1>, scalar_prefetch = 0 : i64, scratch_operands = 0 : i64, tpu.core_type = #tpu.core_type<tc>, window_params = [{transform_indices = @transform_0, window_bounds = array<i64: 1, 64, 16>}, {transform_indices = @transform_1, window_bounds = array<i64: 1, 2, 640>}, {transform_indices = @transform_2, window_bounds = array<i64: 1, 4, 640>}]} {
    %c0 = arith.constant 0 : index
    %c0_0 = arith.constant 0 : index
    %c0_1 = arith.constant 0 : index
    %0 = vector.load %arg3[%c0, %c0_0, %c0_1] : memref<1x2x640xf32, #tpu.memory_space<vmem>>, vector<1x2x640xf32>
    %1 = vector.shape_cast %0 : vector<1x2x640xf32> to vector<2x640xf32>
    %2 = vector.extract_strided_slice %1 {offsets = [0, 0], sizes = [1, 640], strides = [1, 1]} : vector<2x640xf32> to vector<1x640xf32>
    %cst = arith.constant -1.000000e+00 : f32
    %cst_2 = arith.constant 1.600000e+01 : f32
    %3 = vector.broadcast %cst : f32 to vector<1x640xf32>
    %4 = arith.maximumf %3, %2 : vector<1x640xf32>
    %5 = vector.broadcast %cst_2 : f32 to vector<1x640xf32>
    %6 = arith.minimumf %5, %4 : vector<1x640xf32>
    %7 = vector.extract_strided_slice %1 {offsets = [1, 0], sizes = [1, 640], strides = [1, 1]} : vector<2x640xf32> to vector<1x640xf32>
    %cst_3 = arith.constant -1.000000e+00 : f32
    %cst_4 = arith.constant 1.600000e+01 : f32
    %8 = vector.broadcast %cst_3 : f32 to vector<1x640xf32>
    %9 = arith.maximumf %8, %7 : vector<1x640xf32>
    %10 = vector.broadcast %cst_4 : f32 to vector<1x640xf32>
    %11 = arith.minimumf %10, %9 : vector<1x640xf32>
    %12 = math.floor %6 : vector<1x640xf32>
    %13 = math.floor %11 : vector<1x640xf32>
    %14 = arith.fptosi %12 : vector<1x640xf32> to vector<1x640xi32>
    %15 = arith.fptosi %13 : vector<1x640xf32> to vector<1x640xi32>
    %c0_i32 = arith.constant 0 : i32
    %c15_i32 = arith.constant 15 : i32
    %16 = vector.broadcast %c0_i32 : i32 to vector<1x640xi32>
    %17 = arith.maxsi %16, %14 : vector<1x640xi32>
    %18 = vector.broadcast %c15_i32 : i32 to vector<1x640xi32>
    %19 = arith.minsi %18, %17 : vector<1x640xi32>
    %c1_i32 = arith.constant 1 : i32
    %20 = vector.broadcast %c1_i32 : i32 to vector<1x640xi32>
    %21 = arith.addi %14, %20 : vector<1x640xi32>
    %c0_i32_5 = arith.constant 0 : i32
    %c15_i32_6 = arith.constant 15 : i32
    %22 = vector.broadcast %c0_i32_5 : i32 to vector<1x640xi32>
    %23 = arith.maxsi %22, %21 : vector<1x640xi32>
    %24 = vector.broadcast %c15_i32_6 : i32 to vector<1x640xi32>
    %25 = arith.minsi %24, %23 : vector<1x640xi32>
    %c0_i32_7 = arith.constant 0 : i32
    %c15_i32_8 = arith.constant 15 : i32
    %26 = vector.broadcast %c0_i32_7 : i32 to vector<1x640xi32>
    %27 = arith.maxsi %26, %15 : vector<1x640xi32>
    %28 = vector.broadcast %c15_i32_8 : i32 to vector<1x640xi32>
    %29 = arith.minsi %28, %27 : vector<1x640xi32>
    %c1_i32_9 = arith.constant 1 : i32
    %30 = vector.broadcast %c1_i32_9 : i32 to vector<1x640xi32>
    %31 = arith.addi %15, %30 : vector<1x640xi32>
    %c0_i32_10 = arith.constant 0 : i32
    %c15_i32_11 = arith.constant 15 : i32
    %32 = vector.broadcast %c0_i32_10 : i32 to vector<1x640xi32>
    %33 = arith.maxsi %32, %31 : vector<1x640xi32>
    %34 = vector.broadcast %c15_i32_11 : i32 to vector<1x640xi32>
    %35 = arith.minsi %34, %33 : vector<1x640xi32>
    %36 = arith.subf %6, %12 : vector<1x640xf32>
    %cst_12 = arith.constant 1.000000e+00 : f32
    %37 = vector.broadcast %cst_12 : f32 to vector<1x640xf32>
    %38 = arith.subf %37, %36 : vector<1x640xf32>
    %39 = arith.subf %11, %13 : vector<1x640xf32>
    %cst_13 = arith.constant 1.000000e+00 : f32
    %40 = vector.broadcast %cst_13 : f32 to vector<1x640xf32>
    %41 = arith.subf %40, %39 : vector<1x640xf32>
    %42 = tpu.iota {dimensions = array<i32: 0>} : vector<16x640xi32>
    %43 = vector.broadcast %29 : vector<1x640xi32> to vector<16x640xi32>
    %44 = arith.cmpi eq, %42, %43 : vector<16x640xi32>
    %cst_14 = arith.constant 0.000000e+00 : f32
    %45 = vector.shape_cast %41 : vector<1x640xf32> to vector<1x640xf32>
    %46 = vector.broadcast %45 : vector<1x640xf32> to vector<16x640xf32>
    %47 = vector.broadcast %cst_14 : f32 to vector<16x640xf32>
    %48 = arith.select %44, %46, %47 : vector<16x640xi1>, vector<16x640xf32>
    %49 = vector.broadcast %35 : vector<1x640xi32> to vector<16x640xi32>
    %50 = arith.cmpi eq, %42, %49 : vector<16x640xi32>
    %cst_15 = arith.constant 0.000000e+00 : f32
    %51 = vector.shape_cast %39 : vector<1x640xf32> to vector<1x640xf32>
    %52 = vector.broadcast %51 : vector<1x640xf32> to vector<16x640xf32>
    %53 = vector.broadcast %cst_15 : f32 to vector<16x640xf32>
    %54 = arith.select %50, %52, %53 : vector<16x640xi1>, vector<16x640xf32>
    %55 = arith.addf %48, %54 : vector<16x640xf32>
    %56 = tpu.iota {dimensions = array<i32: 0>} : vector<16x640xi32>
    %57 = vector.broadcast %19 : vector<1x640xi32> to vector<16x640xi32>
    %58 = arith.cmpi eq, %56, %57 : vector<16x640xi32>
    %cst_16 = arith.constant 0.000000e+00 : f32
    %59 = vector.shape_cast %38 : vector<1x640xf32> to vector<1x640xf32>
    %60 = vector.broadcast %59 : vector<1x640xf32> to vector<16x640xf32>
    %61 = vector.broadcast %cst_16 : f32 to vector<16x640xf32>
    %62 = arith.select %58, %60, %61 : vector<16x640xi1>, vector<16x640xf32>
    %63 = vector.broadcast %25 : vector<1x640xi32> to vector<16x640xi32>
    %64 = arith.cmpi eq, %56, %63 : vector<16x640xi32>
    %cst_17 = arith.constant 0.000000e+00 : f32
    %65 = vector.shape_cast %36 : vector<1x640xf32> to vector<1x640xf32>
    %66 = vector.broadcast %65 : vector<1x640xf32> to vector<16x640xf32>
    %67 = vector.broadcast %cst_17 : f32 to vector<16x640xf32>
    %68 = arith.select %64, %66, %67 : vector<16x640xi1>, vector<16x640xf32>
    %69 = arith.addf %62, %68 : vector<16x640xf32>
    %c0_18 = arith.constant 0 : index
    %c0_19 = arith.constant 0 : index
    %c0_20 = arith.constant 0 : index
    %70 = vector.load %arg2[%c0_18, %c0_19, %c0_20] : memref<1x64x16xf32, #tpu.memory_space<vmem>>, vector<1x64x16xf32>
    %71 = vector.shape_cast %70 : vector<1x64x16xf32> to vector<64x16xf32>
    %cst_21 = arith.constant dense<0.000000e+00> : vector<64x640xf32>
    %72 = tpu.matmul %71, %55, %cst_21 {dimension_numbers = #tpu.dot_dimension_numbers<[1], [0], [0], [1], [0, 0, 1, 1], [], []>} : vector<64x16xf32>, vector<16x640xf32>, vector<64x640xf32> -> vector<64x640xf32>
    %73 = vector.shape_cast %72 : vector<64x640xf32> to vector<4x16x640xf32>
    %74 = vector.shape_cast %69 : vector<16x640xf32> to vector<1x16x640xf32>
    %75 = vector.broadcast %74 : vector<1x16x640xf32> to vector<4x16x640xf32>
    %76 = arith.mulf %73, %75 : vector<4x16x640xf32>
    %cst_22 = arith.constant dense<0.000000e+00> : vector<4x640xf32>
    %77 = vector.multi_reduction <add>, %76, %cst_22 [1] : vector<4x16x640xf32> to vector<4x640xf32>
    %c0_23 = arith.constant 0 : index
    %c0_24 = arith.constant 0 : index
    %c0_25 = arith.constant 0 : index
    %78 = vector.load %arg4[%c0_23, %c0_24, %c0_25] : memref<1x4x640xf32, #tpu.memory_space<vmem>>, vector<1x4x640xf32>
    %79 = vector.shape_cast %78 : vector<1x4x640xf32> to vector<4x640xf32>
    %80 = vector.shape_cast %77 : vector<4x640xf32> to vector<1x4x640xf32>
    tpu.vector_store %arg4[%c0_23, %c0_24, %c0_25], %80 {strides = array<i32>} : memref<1x4x640xf32, #tpu.memory_space<vmem>>, vector<1x4x640xf32>,
    return
  }
  func.func @transform_0(%arg0: i32, %arg1: i32) -> (i32, i32, i32) {
    %c0_i32 = arith.constant 0 : i32
    %c0_i32_0 = arith.constant 0 : i32
    %c0_i32_1 = arith.constant 0 : i32
    return %arg0, %c0_i32, %c0_i32_0 : i32, i32, i32
  }
  func.func @transform_1(%arg0: i32, %arg1: i32) -> (i32, i32, i32) {
    %c0_i32 = arith.constant 0 : i32
    %c0_i32_0 = arith.constant 0 : i32
    return %arg0, %c0_i32, %arg1 : i32, i32, i32
  }
  func.func @transform_2(%arg0: i32, %arg1: i32) -> (i32, i32, i32) {
    %c0_i32 = arith.constant 0 : i32
    %c0_i32_0 = arith.constant 0 : i32
    return %arg0, %c0_i32, %arg1 : i32, i32, i32
  }
}

</mosaic_0001>

<bundles_post_ra>
// kernel: tpu_custom_call.1
= control target key start
LH: loop header
LB: loop body
LE: loop exit
PB: predicated region body
PF: predicated region fallthrough
CT: control target
= control target key end

     0   :  { %7 = vsyncpa [#allocation3], 0  ;;  %s2132_s0 = inlined_call_operand.vmem [shape: f32[2,64,16], index: 0, kind: input, shape index: {}]   ;;  %s2133_s1 = inlined_call_operand.vmem [shape: f32[2,2,640], index: 1, kind: input, shape index: {}]   ;;  %s2134_s2 = inlined_call_operand.hbm [shape: f32[2,4,640], index: 2, kind: output, shape index: {}]  }
   0x1   :  { %9 = vsyncpa [#allocation3 + $0x1], 0  ;;  %s1624_s9 = smov 0   ;;  %s1626_s10 = smov 0  }
   0x2   :  { %s1628_s11 = smov 0   ;;  %s1630_s12 = smov 0  }
   0x3   :  { %s1632_s13 = smov 0   ;;  %s1634_s14 = smov 0  }
   0x4 LB: > { %s1388_s15 = sadd.s32 4294967295, %s1605_s14   ;;  %s1389_s16 = sadd.s32 4294967294, %s1605_s14   ;;  %s1605_s14 = sphi %s1634_s14, %s15_s14   ;;  %s1601_s13 = sphi %s1632_s13, %s2141_s13   ;;  %s1597_s12 = sphi %s1630_s12, %s2140_s12   ;;  %s1593_s11 = sphi %s1628_s11, %s2139_s11   ;;  %s1589_s10 = sphi %s1626_s10, %s2138_s10   ;;  %s1585_s9 = sphi %s1624_s9, %s2137_s9  }
   0x5   : > { %s27_s17 = sadd.s32 1, %s1601_s13  ;;  %s90_s18 = sadd.s32 1, %s1593_s11 }
   0x6   : > { %p29_p0 = scmp.ge.s32.totalorder %s27_s17, 2  ;;  %p100_p1 = scmp.ne.s32.totalorder %s1593_s11, %s1589_s10 }
   0x7   : > { %p101_p2 = scmp.eq.s32.totalorder %s1388_s15, 1  ;;  %p106_p3 = scmp.ne.s32.totalorder %s1589_s10, %s1585_s9 }
   0x8   : > { %s2143_s17 = smov (%p29_p0, %s27_s17), 0  ;;  %p107_p5 = scmp.eq.s32.totalorder %s1389_s16, 1 }
   0x9   : > { %p1664_p4 = por %p101_p2, %p100_p1  ;;  %s85_s20 = ssub.s32 %s1601_s13, %s2143_s17 }
   0xa   : > { %p1392_p6 = scmp.ge.s32.totalorder %s1605_s14, 1  ;;  %p88_p7 = scmp.eq.s32.totalorder %s85_s20, 0 }
   0xb   : > { %p1671_p8 = por %p107_p5, %p106_p3  ;;  %p146_p9 = scmp.lt.s32.totalorder %s1605_s14, 3 }
   0xc   : > { %s1677_s22 = scalar_select %p88_p7, %s1593_s11, %s90_s18  }
   0xd   : > { %p147_p10 = pnand %p1392_p6, %p146_p9 }
   0xe   : > { %p177_p11 = scmp.lt.s32.totalorder (!%p147_p10), %s1597_s12, 1  ;;  %v1607_v0 = vmov (!%p147_p10), 0.0   ;;  %v225_v1 = vlaneseq (!%p147_p10)  ;;  %vm680_vm10 = vcmask (!%p147_p10), 130048   ;;  %s174_s4 = sand.u32 (!%p147_p10), 1, %s1589_s10  }
   0xf   : > { %150 = sbr.rel (%p147_p10) target bundleno = 354 (0x162), region = 28  ;;  %769 = vmatprep.mubr.f32.mxu0 (!%p147_p10), %v1607_v0  ;;  %805 = vmatprep.mubr.f32.mxu1 (!%p147_p10), %v1607_v0 }
  0x10   : > { %v1689_v5 = vshrl.u32 (!%p147_p10), %v225_v1, 7  ;;  %s1464_s5 = smul.u32 (!%p147_p10), 20, %s174_s4 }
  0x11   : > { %s1470_s7 = smul.u32 (!%p147_p10), 320, %s1597_s12 }
  0x12   : > { %v1692_v10 = vsub.s32 (!%p147_p10), 1, %v1689_v5  ;;  %v234_v11 = vsub.s32 (!%p147_p10), 3, %v1689_v5  ;;  %v1696_v13 = vsub.s32 (!%p147_p10), 7, %v1689_v5  ;;  %v1699_v14 = vsub.s32 (!%p147_p10), 5, %v1689_v5  ;;  %s2063_s6 = scalar_lea.vmem (!%p147_p10), [#allocation2], %s1464_s5 }
  0x13   : > { %v1706_v19 = vadd.s32 (!%p147_p10), 8, %v1689_v5  ;;  %s1300_s8 = sshll.u32 (!%p147_p10), %s2063_s6, 4  ;;  %s2080_s18 = scalar_lea.hbm (!%p147_p10), %s2134_s2, %s1470_s7  ;;  %s2082_s8 = int_to_ptr.vmem [resolvable:$true] %s1300_s8 }
  0x14   : > { %s1527_s20 = scalar_lea.vmem (!%p147_p10), %s2082_s8, 320 }
  0x15   : > { %p1528_p12 = scmp.ne.s32.totalorder (!%p147_p10), %s2082_s8, %s1527_s20 }
  0x16   : > { %s1683_s23 = scalar_select %p177_p11, %s1597_s12, 1 }
  0x17   : > { %s1284_s12 = scalar_lea.sflag [#allocation3], %s174_s4  ;;  %p1529_p13 = pnand %p1528_p12, %p1664_p4 }
  0x18   : > { %s1465_s24 = smul.u32 10, %s1683_s23  ;;  %s1423_s28 = sshll.u32 %s1683_s23, 6 }
  0x19   : > { %s1777_s3 = scalar_lea.vmem %s2132_s0, %s1423_s28  ;;  %p1530_p0 = pneg %p1529_p13 }
  0x1a   : > { %s190_s27 = scalar_lea.vmem %s2133_s1, %s1465_s24  ;;  %s1608_s23 = smov [#allocation2]  }
  0x1b   : > { %v193_v2 = vld [vmem:[%s190_s27] sm:$0xff]  ;;  %v194_v3 = vld [vmem:[%s190_s27 + $0x8] sm:$0x3]  ;;  %s1531_s24 = sshll.u32 %s1608_s23, 4  ;;  %s1532_s24 = int_to_ptr.vmem [resolvable:$false] %s1531_s24 }
  0x1c   : > { %v195_v4 = vmax.f32 %v193_v2, -1.0  ;;  %v196_v6 = vmax.f32 %v194_v3, -1.0  ;;  %s1533_s25 = scalar_lea.vmem %s1532_s24, 640  ;;  %p1534_p1 = scmp.lt.s32.totalorder %s2082_s8, %s1532_s24 }
  0x1d   : > { %p1535_p2 = scmp.lt.s32.totalorder %s1533_s25, %s1527_s20 }
  0x1e   : > { %v197_v7 = vmin.f32 %v195_v4, 16.0  ;;  %v198_v8 = vmin.f32 %v196_v6, 16.0 }
  0x1f   : > { %p1536_p3 = por %p1535_p2, %p1534_p1 }
  0x20   : > { %v199_v9 = vfloor.f32 %v197_v7  ;;  %v200_v12 = vfloor.f32 %v198_v8 }
  0x21   : > { %p1537_p5 = pnand %p1536_p3, %p1530_p0 }
  0x22   : > { %v1466_v15 = vtrunc.f32 %v199_v9  ;;  %v1701_v16 = vsub.f32 %v197_v7, %v199_v9  ;;  %v1468_v17 = vtrunc.f32 %v200_v12  ;;  %v1703_v18 = vsub.f32 %v198_v8, %v200_v12 }
  0x24   : > { %v1467_v20 = vcvt.f32.s32 %v1466_v15  ;;  %v1709_v21 = vsub.f32 1.0, %v1701_v16  ;;  %v394_v22 = vrot.slane %v1701_v16, %v234_v11  ;;  %v390_v23 = vrot.slane %v1701_v16, %v1692_v10 }
  0x25   : > { %v402_v24 = vrot.slane %v1701_v16, %v1696_v13  ;;  %v398_v25 = vrot.slane %v1701_v16, %v1699_v14  ;;  %v1718_v26 = vcvt.f32.s32 %v1468_v17  ;;  %v224_v27 = vsub.f32 1.0, %v1703_v18 }
  0x26   : > { %vm203_vm0 = vcmp.gt.s32.totalorder %v1467_v20, 0  ;;  %v211_v28 = vadd.s32 1, %v1467_v20  ;;  %v287_v29 = vrot.slane %v1709_v21, %v234_v11  ;;  %v419_v30 = vrot.slane %v394_v22, %v1692_v10 }
  0x27   : > { %v204_v31 = vsel %vm203_vm0, %v1467_v20, 0  ;;  %v283_v32 = vrot.slane %v1709_v21, %v1692_v10  ;;  %v415_v33 = vrot.slane %v390_v23, %v1692_v10  ;;  %v295_v34 = vrot.slane %v1709_v21, %v1696_v13 }
  0x28   : > { %vm207_vm1 = vcmp.lt.s32.totalorder %v204_v31, 15  ;;  %vm213_vm2 = vcmp.gt.s32.totalorder %v211_v28, 0  ;;  %v312_v35 = vrot.slane %v287_v29, %v1692_v10  ;;  %v1730_v36 = vrot.slane %v402_v24, %v1692_v10 }
  0x29   : > { %v1732_v37 = vsel %vm207_vm1, %v204_v31, 15  ;;  %v214_v38 = vsel %vm213_vm2, %v211_v28, 0  ;;  %v308_v39 = vrot.slane %v283_v32, %v1692_v10  ;;  %v320_v40 = vrot.slane %v295_v34, %v1692_v10 }
  0x2a   : > { %vm217_vm3 = vcmp.lt.s32.totalorder %v214_v38, 15  ;;  %v235_v41 = vrot.slane %v1732_v37, %v234_v11  ;;  %v231_v42 = vrot.slane %v1732_v37, %v1692_v10  ;;  %v243_v43 = vrot.slane %v1732_v37, %v1696_v13 }
  0x2b   : > { %v1741_v44 = vsel %vm217_vm3, %v214_v38, 15  ;;  %v239_v45 = vrot.slane %v1732_v37, %v1699_v14  ;;  %v291_v46 = vrot.slane %v1709_v21, %v1699_v14  ;;  %v1748_v47 = vrot.slane %v398_v25, %v1692_v10  ;;  %v1793_v25 = vld [vmem:[%s1777_s3 + $0x30] sm:$0xff] }
  0x2c   : > { %v255_v48 = vrot.slane %v235_v41, %v1692_v10  ;;  %v342_v49 = vrot.slane %v1741_v44, %v234_v11  ;;  %v251_v50 = vrot.slane %v231_v42, %v1692_v10  ;;  %v338_v51 = vrot.slane %v1741_v44, %v1692_v10 }
  0x2d   : > { %v263_v52 = vrot.slane %v243_v43, %v1692_v10  ;;  %v350_v53 = vrot.slane %v1741_v44, %v1696_v13  ;;  %v259_v54 = vrot.slane %v239_v45, %v1692_v10  ;;  %v316_v55 = vrot.slane %v291_v46, %v1692_v10  ;;  %v673_v45 = vld [vmem:[%s1777_s3 + $0x8] sm:$0xff]  ;;  %v679_v46 = vld [vmem:[%s1777_s3 + $0x38] sm:$0xff] }
  0x2e   : > { %vm269_vm4 = vcmp.eq.s32.totalorder %v1689_v5, %v255_v48  ;;  %vm274_vm5 = vcmp.eq.s32.totalorder %v1706_v19, %v255_v48  ;;  %v362_v56 = vrot.slane %v342_v49, %v1692_v10  ;;  %vm268_vm6 = vcmp.eq.s32.totalorder %v1689_v5, %v251_v50 }
  0x2f   : > { %v326_v57 = vsel %vm269_vm4, %v312_v35, 0.0  ;;  %v331_v58 = vsel %vm274_vm5, %v312_v35, 0.0  ;;  %vm273_vm7 = vcmp.eq.s32.totalorder %v1706_v19, %v251_v50  ;;  %v325_v59 = vsel %vm268_vm6, %v308_v39, 0.0 }
  0x30   : > { %vm376_vm8 = vcmp.eq.s32.totalorder %v1689_v5, %v362_v56  ;;  %vm381_vm9 = vcmp.eq.s32.totalorder %v1706_v19, %v362_v56  ;;  %v330_v60 = vsel %vm273_vm7, %v308_v39, 0.0  ;;  %v358_v61 = vrot.slane %v338_v51, %v1692_v10 }
  0x31   : > { %v433_v62 = vsel %vm376_vm8, %v419_v30, 0.0  ;;  %v438_v63 = vsel %vm381_vm9, %v419_v30, 0.0  ;;  %vm271_vm11 = vcmp.eq.s32.totalorder %v1689_v5, %v263_v52  ;;  %vm276_vm12 = vcmp.eq.s32.totalorder %v1706_v19, %v263_v52  ;;  %v674_v52 = vld [vmem:[%s1777_s3 + $0x10] sm:$0xff] }
  0x32   : > { %v443_v1 = vadd.f32 %v433_v62, %v326_v57  ;;  %v448_v2 = vadd.f32 %v438_v63, %v331_v58  ;;  %vm375_vm13 = vcmp.eq.s32.totalorder %v1689_v5, %v358_v61  ;;  %vm380_vm14 = vcmp.eq.s32.totalorder %v1706_v19, %v358_v61  ;;  %v675_v58 = vld [vmem:[%s1777_s3 + $0x18] sm:$0xff]  ;;  %v677_v61 = vld [vmem:[%s1777_s3 + $0x28] sm:$0xff] }
  0x33   : > { %v432_v3 = vsel %vm375_vm13, %v415_v33, 0.0  ;;  %v437_v4 = vsel %vm380_vm14, %v415_v33, 0.0  ;;  %v328_v6 = vsel %vm271_vm11, %v320_v40, 0.0  ;;  %v333_v7 = vsel %vm276_vm12, %v320_v40, 0.0 }
  0x34   : > { %v1450_v8 = vpack.c.bf16 %v448_v2, %v443_v1  ;;  %v442_v9 = vadd.f32 %v432_v3, %v325_v59  ;;  %v447_v11 = vadd.f32 %v437_v4, %v330_v60  ;;  %v370_v12 = vrot.slane %v350_v53, %v1692_v10  ;;  %v676_v60 = vld [vmem:[%s1777_s3 + $0x20] sm:$0xff] }
  0x35   : > { %vm270_vm15 = vcmp.eq.s32.totalorder %v1689_v5, %v259_v54  ;;  %vm275_vm0 = vcmp.eq.s32.totalorder %v1706_v19, %v259_v54  ;;  %v346_v13 = vrot.slane %v1741_v44, %v1699_v14  ;;  %vm205_vm1 = vcmp.gt.s32.totalorder %v1718_v26, 0  ;;  %v1790_v14 = vld [vmem:[%s1777_s3] sm:$0xff] }
  0x36   : > { %1451 = vmatprep.subr.bf16.mxu0 %v1450_v8  ;;  %1462 = vmatprep.subr.bf16.mxu1 %v1450_v8  ;;  %v1452_v15 = vpack.c.bf16 %v447_v11, %v442_v9  ;;  %vm378_vm2 = vcmp.eq.s32.totalorder %v1689_v5, %v370_v12  ;;  %vm383_vm3 = vcmp.eq.s32.totalorder %v1706_v19, %v370_v12  ;;  %v327_v17 = vsel %vm270_vm15, %v316_v55, 0.0 }
  0x37   : > { %v435_v20 = vsel %vm378_vm2, %v1730_v36, 0.0  ;;  %v440_v22 = vsel %vm383_vm3, %v1730_v36, 0.0  ;;  %v332_v23 = vsel %vm275_vm0, %v316_v55, 0.0  ;;  %v366_v24 = vrot.slane %v346_v13, %v1692_v10 }
  0x38   : > { %1453 = vmatpush1.bf16.msra.mxu0 %v1452_v15  ;;  %1463 = vmatpush1.bf16.msra.mxu1 %v1452_v15  ;;  %v445_v28 = vadd.f32 %v435_v20, %v328_v6  ;;  %v450_v29 = vadd.f32 %v440_v22, %v333_v7  ;;  %v206_v30 = vsel %vm205_vm1, %v1718_v26, 0  ;;  %v212_v31 = vadd.s32 1, %v1718_v26 }
  0x39   : > { %vm377_vm4 = vcmp.eq.s32.totalorder %v1689_v5, %v366_v24  ;;  %vm382_vm5 = vcmp.eq.s32.totalorder %v1706_v19, %v366_v24  ;;  %vm209_vm6 = vcmp.lt.s32.totalorder %v206_v30, 15  ;;  %v299_v32 = vrot.slane %v224_v27, %v1692_v10 }
  0x3a   : > { %v1454_v33 = vpack.c.bf16 %v450_v29, %v445_v28  ;;  %v434_v34 = vsel %vm377_vm4, %v1748_v47, 0.0  ;;  %v439_v35 = vsel %vm382_vm5, %v1748_v47, 0.0  ;;  %v1806_v36 = vsel %vm209_vm6, %v206_v30, 15 }
  0x3b   : > { %1396 = vmatmul.mubr.msk.f32.vlgmr.msra.gmra.mrb[0].mxu0 %vm680_vm10, %v1790_v14  ;;  %1402 = vmatmul.mubr.msk.f32.vlgmr.msra.gmra.mrb[0].mxu1 %vm680_vm10, %v1793_v25  ;;  %v444_v26 = vadd.f32 %v434_v34, %v327_v17  ;;  %v449_v38 = vadd.f32 %v439_v35, %v332_v23  ;;  %vm215_vm7 = vcmp.gt.s32.totalorder %v212_v31, 0  ;;  %v247_v39 = vrot.slane %v1806_v36, %v1692_v10 }
  0x3c   : > { %1455 = vmatprep.subr.bf16.mxu1 %v1454_v33  ;;  %v216_v40 = vsel %vm215_vm7, %v212_v31, 0  ;;  %v406_v41 = vrot.slane %v1703_v18, %v1692_v10  ;;  %775 = vmatprep.mubr.f32.mxu0 %v1607_v0  ;;  %v324_v48 = vrot.slane %v299_v32, %v1692_v10  ;;  %v1875_v62 = vsub.s32 0, %v1689_v5 }
  0x3d   : > { %v1456_v42 = vpack.c.bf16 %v449_v38, %v444_v26  ;;  %vm219_vm8 = vcmp.lt.s32.totalorder %v216_v40, 15  ;;  %v267_v43 = vrot.slane %v247_v39, %v1692_v10  ;;  %811 = vmatprep.mubr.f32.mxu1 %v1607_v0  ;;  %v458_v13 = vsub.s32 2, %v1689_v5 }
  0x3e   : > { %v1821_v47 = vsel %vm219_vm8, %v216_v40, 15  ;;  %v431_v50 = vrot.slane %v406_v41, %v1692_v10  ;;  %v471_v63 = vrot.slane %v1806_v36, %v1875_v62  ;;  %v626_v2 = vrot.slane %v1703_v18, %v1875_v62 }
  0x3f   : > { %1457 = vmatpush1.bf16.msra.mxu1 %v1456_v42  ;;  %vm272_vm9 = vcmp.eq.s32.totalorder %v1689_v5, %v267_v43  ;;  %vm277_vm11 = vcmp.eq.s32.totalorder %v1706_v19, %v267_v43  ;;  %v354_v49 = vrot.slane %v1821_v47, %v1692_v10  ;;  %1397 = vmatmul.mubr.msk.f32.gmra.mrb[2].mxu0 %vm680_vm10, %v673_v45  ;;  %v462_v20 = vsub.s32 4, %v1689_v5 }
  0x40   : > { %1403 = vmatmul.mubr.msk.f32.gmra.mrb[2].mxu1 %vm680_vm10, %v679_v46  ;;  %781 = vmatprep.mubr.f32.mxu0 %v1607_v0  ;;  %v329_v53 = vsel %vm272_vm9, %v324_v48, 0.0  ;;  %v334_v54 = vsel %vm277_vm11, %v324_v48, 0.0  ;;  %v576_v1 = vrot.slane %v1821_v47, %v1875_v62  ;;  %v491_v3 = vrot.slane %v471_v63, %v1875_v62 }
  0x41   : > { %v374_v51 = vrot.slane %v354_v49, %v1692_v10  ;;  %882 = vmatprep.mubr.f32.mxu1 %v1607_v0  ;;  %v651_v7 = vrot.slane %v626_v2, %v1875_v62  ;;  %v455_v15 = vrot.slane %v1732_v37, %v1875_v62  ;;  %v560_v17 = vrot.slane %v1741_v44, %v1875_v62 }
  0x42   : > { %v596_v4 = vrot.slane %v576_v1, %v1875_v62  ;;  %vm496_vm15 = vcmp.eq.s32.totalorder %v1689_v5, %v491_v3  ;;  %v459_v22 = vrot.slane %v1732_v37, %v458_v13  ;;  %v564_v23 = vrot.slane %v1741_v44, %v458_v13 }
  0x43   : > { %vm379_vm12 = vcmp.eq.s32.totalorder %v1689_v5, %v374_v51  ;;  %vm384_vm13 = vcmp.eq.s32.totalorder %v1706_v19, %v374_v51  ;;  %1398 = vmatmul.mubr.msk.f32.gmra.mrb[4].mxu0 %vm680_vm10, %v674_v52  ;;  %v475_v24 = vrot.slane %v455_v15, %v1875_v62  ;;  %v610_v28 = vrot.slane %v1701_v16, %v1875_v62 }
  0x44   : > { %v436_v55 = vsel %vm379_vm12, %v431_v50, 0.0  ;;  %v441_v56 = vsel %vm384_vm13, %v431_v50, 0.0  ;;  %1404 = vmatmul.mubr.msk.f32.vlgmr.msra.gmra.mrb[4].mxu1 %vm680_vm10, %v1790_v14  ;;  %787 = vmatprep.mubr.f32.mxu0 %v1607_v0  ;;  %vm606_vm14 = vcmp.eq.s32.totalorder %v1706_v19, %v596_v4  ;;  %vm601_vm0 = vcmp.eq.s32.totalorder %v1689_v5, %v596_v4 }
  0x45   : > { %v446_v10 = vadd.f32 %v436_v55, %v329_v53  ;;  %v451_v57 = vadd.f32 %v441_v56, %v334_v54  ;;  %888 = vmatprep.mubr.f32.mxu1 %v1607_v0  ;;  %v661_v9 = vsel %vm606_vm14, %v651_v7, 0.0  ;;  %v656_v11 = vsel %vm601_vm0, %v651_v7, 0.0 }
  0x46   : > { %v466_v29 = vsub.s32 6, %v1689_v5  ;;  %v509_v30 = vrot.slane %v1709_v21, %v458_v13  ;;  %v614_v31 = vrot.slane %v1701_v16, %v458_v13  ;;  %v463_v32 = vrot.slane %v1732_v37, %v462_v20 }
  0x47   : > { %v1458_v59 = vpack.c.bf16 %v451_v57, %v446_v10  ;;  %1399 = vmatmul.mubr.msk.f32.gmra.mrb[6].mxu0 %vm680_vm10, %v675_v58  ;;  %v568_v33 = vrot.slane %v1741_v44, %v462_v20  ;;  %v479_v34 = vrot.slane %v459_v22, %v1875_v62  ;;  %v584_v35 = vrot.slane %v564_v23, %v1875_v62 }
  0x48   : > { %1405 = vmatmul.mubr.msk.f32.gmra.mrb[6].mxu1 %vm680_vm10, %v673_v45  ;;  %793 = vmatprep.mubr.f32.mxu0 %v1607_v0  ;;  %vm492_vm1 = vcmp.eq.s32.totalorder %v1689_v5, %v475_v24  ;;  %v635_v26 = vrot.slane %v610_v28, %v1875_v62  ;;  %v513_v38 = vrot.slane %v1709_v21, %v462_v20 }
  0x49   : > { %1459 = vmatprep.subr.bf16.mxu0 %v1458_v59  ;;  %894 = vmatprep.mubr.f32.mxu1 %v1607_v0  ;;  %v618_v39 = vrot.slane %v1701_v16, %v462_v20  ;;  %v467_v40 = vrot.slane %v1732_v37, %v466_v29  ;;  %v572_v41 = vrot.slane %v1741_v44, %v466_v29 }
  0x4a   : > { %1461 = vmatpush3.bf16.msra.mxu0 %v1458_v59  ;;  %v534_v42 = vrot.slane %v509_v30, %v1875_v62  ;;  %v639_v43 = vrot.slane %v614_v31, %v1875_v62  ;;  %vm493_vm3 = vcmp.eq.s32.totalorder %v1689_v5, %v479_v34  ;;  %vm598_vm4 = vcmp.eq.s32.totalorder %v1689_v5, %v584_v35 }
  0x4b   : > { %1400 = vmatmul.mubr.msk.f32.gmra.mrb[8].mxu0 %vm680_vm10, %v676_v60  ;;  %vm497_vm5 = vcmp.eq.s32.totalorder %v1706_v19, %v475_v24  ;;  %vm498_vm7 = vcmp.eq.s32.totalorder %v1706_v19, %v479_v34  ;;  %vm603_vm8 = vcmp.eq.s32.totalorder %v1706_v19, %v584_v35  ;;  %v517_v37 = vrot.slane %v1709_v21, %v466_v29 }
  0x4c   : > { %1406 = vmatmul.mubr.msk.f32.gmra.mrb[8].mxu1 %vm680_vm10, %v674_v52  ;;  %799 = vmatprep.mubr.f32.mxu0 %v1607_v0  ;;  %v622_v44 = vrot.slane %v1701_v16, %v466_v29  ;;  %v538_v47 = vrot.slane %v513_v38, %v1875_v62  ;;  %v643_v48 = vrot.slane %v618_v39, %v1875_v62  ;;  %v548_v16 = vsel %vm493_vm3, %v534_v42, 0.0 }
  0x4d   : > { %900 = vmatprep.mubr.f32.mxu1 %v1607_v0  ;;  %v487_v49 = vrot.slane %v467_v40, %v1875_v62  ;;  %v592_v50 = vrot.slane %v572_v41, %v1875_v62  ;;  %v553_v10 = vsel %vm498_vm7, %v534_v42, 0.0  ;;  %v658_v57 = vsel %vm603_vm8, %v639_v43, 0.0 }
  0x4e   : > { %v647_v59 = vrot.slane %v622_v44, %v1875_v62  ;;  %v1973_v4 = vadd.f32 %v658_v57, %v553_v10  ;;  %vm1250_vm3 = vcmask 1042434  }
  0x4f   : > { %1401 = vmatmul.mubr.msk.f32.gmra.mrb[10].mxu0 %vm680_vm10, %v677_v61  ;;  %vm495_vm12 = vcmp.eq.s32.totalorder %v1689_v5, %v487_v49  ;;  %vm600_vm13 = vcmp.eq.s32.totalorder %v1689_v5, %v592_v50  ;;  %vm605_vm0 = vcmp.eq.s32.totalorder %v1706_v19, %v592_v50 }
  0x50   : > { %1407 = vmatmul.mubr.msk.f32.gmra.mrb[10].mxu1 %vm680_vm10, %v675_v58  ;;  %1438 = vmatprep.mubr.msk.f32.mxu0 %vm680_vm10, %v1790_v14  ;;  %v505_v14 = vrot.slane %v1709_v21, %v1875_v62  ;;  %v653_v21 = vsel %vm598_vm4, %v639_v43, 0.0  ;;  %v655_v7 = vsel %vm600_vm13, %v647_v59, 0.0  ;;  %v660_v30 = vsel %vm605_vm0, %v647_v59, 0.0 }
  0x51   : > { %906 = vmatprep.mubr.f32.mxu1 %v1607_v0  ;;  %vm1252_vm4 = vcmask 1046534  }
  0x52   : > { %v530_v36 = vrot.slane %v505_v14, %v1875_v62 }
  0x53   : > { %1439 = vmatmul.mubr.msk.f32.vlgmr.msra.gmra.mrb[12].mxu0 %vm680_vm10, %v673_v45  ;;  %v483_v45 = vrot.slane %v463_v32, %v1875_v62 }
  0x54   : > { %1408 = vmatmul.mubr.msk.f32.gmra.mrb[12].mxu1 %vm680_vm10, %v676_v60  ;;  %1441 = vmatprep.mubr.msk.f32.mxu0 %vm680_vm10, %v674_v52  ;;  %v547_v51 = vsel %vm492_vm1, %v530_v36, 0.0  ;;  %v552_v53 = vsel %vm497_vm5, %v530_v36, 0.0  ;;  %vm1245_vm1 = vcmask 1041409   ;;  %vm1255_vm5 = vcmask 1043459  }
  0x55   : > { %912 = vmatprep.mubr.f32.mxu1 %v1607_v0  ;;  %vm494_vm9 = vcmp.eq.s32.totalorder %v1689_v5, %v483_v45 }
  0x56   : > { %v549_v63 = vsel %vm494_vm9, %v538_v47, 0.0 }
  0x57   : > { %1442 = vmatmul.mubr.msk.f32.gmra.mrb[14].mxu0 %vm680_vm10, %v675_v58  ;;  %v542_v58 = vrot.slane %v517_v37, %v1875_v62 }
  0x58   : > { %1409 = vmatmul.mubr.msk.f32.gmra.mrb[14].mxu1 %vm680_vm10, %v677_v61  ;;  %1444 = vmatprep.mubr.msk.f32.mxu0 %vm680_vm10, %v676_v60 }
  0x59   : > { %918 = vmatprep.mubr.f32.mxu1 %v1607_v0 }
  0x5b   : > { %1445 = vmatmul.mubr.msk.f32.gmra.mrb[16].mxu0 %vm680_vm10, %v677_v61 }
  0x5c   : > { %1410 = vmatmul.mubr.msk.f32.gmra.mrb[16].mxu1 %vm680_vm10, %v1793_v25  ;;  %1447 = vmatprep.mubr.msk.f32.mxu0 %vm680_vm10, %v1793_v25  ;;  %v580_v25 = vrot.slane %v560_v17, %v1875_v62 }
  0x5d   : > { %924 = vmatprep.mubr.f32.mxu1 %v1607_v0  ;;  %v521_v0 = vrot.slane %v224_v27, %v1875_v62 }
  0x5e   : > { %vm597_vm2 = vcmp.eq.s32.totalorder %v1689_v5, %v580_v25  ;;  %vm602_vm6 = vcmp.eq.s32.totalorder %v1706_v19, %v580_v25 }
  0x5f   : > { %1448 = vmatmul.mubr.msk.f32.gmra.mrb[18].mxu0 %vm680_vm10, %v679_v46  ;;  %v546_v6 = vrot.slane %v521_v0, %v1875_v62  ;;  %v652_v52 = vsel %vm597_vm2, %v635_v26, 0.0  ;;  %v657_v54 = vsel %vm602_vm6, %v635_v26, 0.0  ;;  %vm1247_vm2 = vcmask 1045509  }
  0x60   : > { %1411 = vmatmul.mubr.msk.f32.gmra.mrb[18].mxu1 %vm680_vm10, %v679_v46  ;;  %vm501_vm10 = vcmp.eq.s32.totalorder %v1706_v19, %v491_v3  ;;  %v588_v46 = vrot.slane %v568_v33, %v1875_v62  ;;  %v1965_v0 = vadd.f32 %v652_v52, %v547_v51  ;;  %v1967_v2 = vadd.f32 %v657_v54, %v552_v53 }
  0x61   : > { %v556_v8 = vsel %vm501_vm10, %v546_v6, 0.0  ;;  %v551_v18 = vsel %vm496_vm15, %v546_v6, 0.0  ;;  %vm499_vm10 = vcmp.eq.s32.totalorder %v1706_v19, %v483_v45  ;;  %v1971_v3 = vadd.f32 %v653_v21, %v548_v16 }
  0x62   : > { %v1894_v27 = vadd.f32 %v661_v9, %v556_v8  ;;  %v1896_v12 = vadd.f32 %v656_v11, %v551_v18  ;;  %vm599_vm11 = vcmp.eq.s32.totalorder %v1689_v5, %v588_v46  ;;  %vm604_vm14 = vcmp.eq.s32.totalorder %v1706_v19, %v588_v46 }
  0x63   : > { %v654_v1 = vsel %vm599_vm11, %v643_v48, 0.0  ;;  %v550_v6 = vsel %vm495_vm12, %v542_v58, 0.0  ;;  %v554_v18 = vsel %vm499_vm10, %v538_v47, 0.0  ;;  %v659_v5 = vsel %vm604_vm14, %v643_v48, 0.0 }
  0x64   : > { %v1975_v62 = vadd.f32 %v654_v1, %v549_v63  ;;  %vm500_vm15 = vcmp.eq.s32.totalorder %v1706_v19, %v487_v49  ;;  %v1987_v34 = vadd.f32 %v655_v7, %v550_v6  ;;  %v1989_v40 = vadd.f32 %v659_v5, %v554_v18 }
  0x65   : > { %v555_v29 = vsel %vm500_vm15, %v542_v58, 0.0  ;;  %vm1257_vm6 = vcmask 1047559  }
  0x66   : > { %v1991_v43 = vadd.f32 %v660_v30, %v555_v29 }
 0x10e   : > { %v807_v55 = vpop.f32.mrb[0].mxu1  ;;  %v771_v56 = vpop.f32.mrb[0].mxu0 }
 0x10f   : > { %v809_v60 = vpop.f32.mrb[1].mxu1  ;;  %v773_v61 = vpop.f32.mrb[1].mxu0  ;;  %v1066_v11 = vmul.f32 %v807_v55, %v1965_v0  ;;  %v1036_v13 = vmul.f32 %v771_v56, %v1965_v0 }
 0x110   : > { %v1067_v23 = vmul.f32 %v809_v60, %v1971_v3  ;;  %v1037_v24 = vmul.f32 %v773_v61, %v1971_v3 }
 0x112   : > { %v777_v8 = vpop.f32.mrb[2].mxu0 }
 0x113   : > { %v813_v9 = vpop.f32.mrb[2].mxu1  ;;  %v1041_v15 = vmul.f32 %v777_v8, %v1967_v2  ;;  %v779_v20 = vpop.f32.mrb[3].mxu0 }
 0x114   : > { %v1071_v17 = vmul.f32 %v813_v9, %v1967_v2  ;;  %v815_v22 = vpop.f32.mrb[3].mxu1  ;;  %v1042_v14 = vmul.f32 %v779_v20, %v1973_v4 }
 0x115   : > { %v1072_v25 = vmul.f32 %v815_v22, %v1973_v4  ;;  %v1076_v28 = vadd.f32 %v1041_v15, %v1036_v13 }
 0x116   : > { %v1181_v19 = vadd.f32 %v1071_v17, %v1066_v11  ;;  %v1083_v31 = vadd.f32 %v1042_v14, %v1037_v24  ;;  %v783_v35 = vpop.f32.mrb[4].mxu0 }
 0x117   : > { %v1188_v32 = vadd.f32 %v1072_v25, %v1067_v23  ;;  %v884_v33 = vpop.f32.mrb[4].mxu1  ;;  %v1077_v36 = vrot.slane %v1076_v28, 4  ;;  %v785_v39 = vpop.f32.mrb[5].mxu0  ;;  %v1046_v44 = vmul.f32 %v783_v35, %v1965_v0 }
 0x118   : > { %v1182_v26 = vrot.slane %v1181_v19, 4  ;;  %v886_v38 = vpop.f32.mrb[5].mxu1  ;;  %v1084_v41 = vrot.slane %v1083_v31, 4  ;;  %v1038_v37 = vmul.f32 %v884_v33, %v1975_v62  ;;  %v1047_v50 = vmul.f32 %v785_v39, %v1971_v3 }
 0x119   : > { %v1189_v42 = vrot.slane %v1188_v32, 4  ;;  %v1078_v45 = vadd.f32 %v1077_v36, %v1076_v28  ;;  %v1039_v49 = vmul.f32 %v886_v38, %v1987_v34 }
 0x11a   : > { %v1183_v46 = vadd.f32 %v1182_v26, %v1181_v19  ;;  %v1085_v47 = vadd.f32 %v1084_v41, %v1083_v31  ;;  %v789_v51 = vpop.f32.mrb[6].mxu0 }
 0x11b   : > { %v1190_v48 = vadd.f32 %v1189_v42, %v1188_v32  ;;  %v890_v52 = vpop.f32.mrb[6].mxu1  ;;  %v1079_v16 = vrot.slane %v1078_v45, 2  ;;  %v1051_v53 = vmul.f32 %v789_v51, %v1967_v2  ;;  %v791_v55 = vpop.f32.mrb[7].mxu0 }
 0x11c   : > { %v1184_v21 = vrot.slane %v1183_v46, 2  ;;  %v1043_v54 = vmul.f32 %v890_v52, %v1989_v40  ;;  %v892_v56 = vpop.f32.mrb[7].mxu1  ;;  %v1086_v10 = vrot.slane %v1085_v47, 2  ;;  %v1052_v58 = vmul.f32 %v791_v55, %v1973_v4 }
 0x11d   : > { %v1191_v57 = vrot.slane %v1190_v48, 2  ;;  %v1044_v59 = vmul.f32 %v892_v56, %v1991_v43  ;;  %v1080_v60 = vadd.f32 %v1079_v16, %v1078_v45  ;;  %v1111_v63 = vadd.f32 %v1051_v53, %v1046_v44 }
 0x11e   : > { %v1185_v61 = vadd.f32 %v1184_v21, %v1183_v46  ;;  %v1090_v1 = vadd.f32 %v1043_v54, %v1038_v37  ;;  %v1087_v6 = vadd.f32 %v1086_v10, %v1085_v47  ;;  %v1118_v8 = vadd.f32 %v1052_v58, %v1047_v50  ;;  %v795_v5 = vpop.f32.mrb[8].mxu0 }
 0x11f   : > { %v1192_v7 = vadd.f32 %v1191_v57, %v1190_v48  ;;  %v1097_v9 = vadd.f32 %v1044_v59, %v1039_v49  ;;  %v896_v18 = vpop.f32.mrb[8].mxu1  ;;  %v1081_v11 = vrot.slane %v1080_v60, 1  ;;  %v1112_v15 = vrot.slane %v1111_v63, 4  ;;  %v797_v22 = vpop.f32.mrb[9].mxu0 }
 0x120   : > { %v1186_v13 = vrot.slane %v1185_v61, 1  ;;  %v1091_v17 = vrot.slane %v1090_v1, 4  ;;  %v898_v20 = vpop.f32.mrb[9].mxu1  ;;  %v1088_v23 = vrot.slane %v1087_v6, 1  ;;  %v1119_v14 = vrot.slane %v1118_v8, 4 }
 0x121   : > { %v1193_v24 = vrot.slane %v1192_v7, 1  ;;  %v1098_v25 = vrot.slane %v1097_v9, 4  ;;  %v2001_v28 = vadd.f32 %v1081_v11, %v1080_v60  ;;  %v1113_v29 = vadd.f32 %v1112_v15, %v1111_v63 }
 0x122   : > { %v2003_v19 = vadd.f32 %v1186_v13, %v1185_v61  ;;  %v1092_v30 = vadd.f32 %v1091_v17, %v1090_v1  ;;  %v2005_v31 = vadd.f32 %v1088_v23, %v1087_v6  ;;  %v1120_v33 = vadd.f32 %v1119_v14, %v1118_v8  ;;  %v801_v36 = vpop.f32.mrb[10].mxu0 }
 0x123   : > { %v2007_v32 = vadd.f32 %v1193_v24, %v1192_v7  ;;  %v1099_v35 = vadd.f32 %v1098_v25, %v1097_v9  ;;  %v902_v26 = vpop.f32.mrb[10].mxu1  ;;  %v1114_v38 = vrot.slane %v1113_v29, 2  ;;  %v1048_v41 = vmul.f32 %v896_v18, %v1975_v62  ;;  %v803_v42 = vpop.f32.mrb[11].mxu0 }
 0x124   : > { %v1093_v39 = vrot.slane %v1092_v30, 2  ;;  %v904_v45 = vpop.f32.mrb[11].mxu1  ;;  %v1236_v46 = vcombine.low %v2001_v28, %v2005_v31  ;;  %v1121_v44 = vrot.slane %v1120_v33, 2  ;;  %v1049_v50 = vmul.f32 %v898_v20, %v1987_v34 }
 0x125   : > { %v1242_v37 = vcombine.low %v2003_v19, %v2007_v32  ;;  %v1100_v47 = vrot.slane %v1099_v35, 2  ;;  %v1115_v48 = vadd.f32 %v1114_v38, %v1113_v29  ;;  %v1056_v51 = vmul.f32 %v795_v5, %v1965_v0 }
 0x126   : > { %v1094_v49 = vadd.f32 %v1093_v39, %v1092_v30  ;;  %v1122_v52 = vadd.f32 %v1121_v44, %v1120_v33  ;;  %v1057_v21 = vmul.f32 %v797_v22, %v1971_v3  ;;  %v1061_v53 = vmul.f32 %v801_v36, %v1967_v2  ;;  %v1440_v55 = vpop.f32.mrb[12].mxu0 }
 0x127   : > { %v1101_v16 = vadd.f32 %v1100_v47, %v1099_v35  ;;  %v908_v54 = vpop.f32.mrb[12].mxu1  ;;  %v1116_v56 = vrot.slane %v1115_v48, 1  ;;  %v1053_v57 = vmul.f32 %v902_v26, %v1989_v40  ;;  %v1062_v58 = vmul.f32 %v803_v42, %v1973_v4  ;;  %v997_v60 = vpop.f32.mrb[13].mxu0 }
 0x128   : > { %v1095_v10 = vrot.slane %v1094_v49, 1  ;;  %v910_v59 = vpop.f32.mrb[13].mxu1  ;;  %v1123_v61 = vrot.slane %v1122_v52, 1  ;;  %v1146_v0 = vadd.f32 %v1061_v53, %v1056_v51  ;;  %v1054_v1 = vmul.f32 %v904_v45, %v1991_v43 }
 0x129   : > { %v1102_v63 = vrot.slane %v1101_v16, 1  ;;  %v1117_v6 = vadd.f32 %v1116_v56, %v1115_v48  ;;  %v1125_v3 = vadd.f32 %v1053_v57, %v1048_v41  ;;  %v1153_v2 = vadd.f32 %v1062_v58, %v1057_v21 }
 0x12a   : > { %v2021_v7 = vadd.f32 %v1095_v10, %v1094_v49  ;;  %v1124_v8 = vadd.f32 %v1123_v61, %v1122_v52  ;;  %v1147_v18 = vrot.slane %v1146_v0, 4  ;;  %v1132_v5 = vadd.f32 %v1054_v1, %v1049_v50  ;;  %v1443_v13 = vpop.f32.mrb[14].mxu0 }
 0x12b   : > { %v2023_v9 = vadd.f32 %v1102_v63, %v1101_v16  ;;  %v914_v11 = vpop.f32.mrb[14].mxu1  ;;  %v1126_v4 = vrot.slane %v1125_v3, 4  ;;  %v1154_v15 = vrot.slane %v1153_v2, 4  ;;  %v1058_v17 = vmul.f32 %v908_v54, %v1975_v62  ;;  %v1007_v23 = vpop.f32.mrb[15].mxu0 }
 0x12c   : > { %v1045_v20 = vmul.f32 %v1440_v55, %v1894_v27  ;;  %v916_v22 = vpop.f32.mrb[15].mxu1  ;;  %v1238_v24 = vcombine.low %v1117_v6, %v1124_v8  ;;  %v1148_v25 = vadd.f32 %v1147_v18, %v1146_v0  ;;  %v1133_v29 = vrot.slane %v1132_v5, 4 }
 0x12d   : > { %v1237_v14 = vcombine.low %v2021_v7, %v2023_v9  ;;  %v1127_v30 = vadd.f32 %v1126_v4, %v1125_v3  ;;  %v1155_v33 = vadd.f32 %v1154_v15, %v1153_v2  ;;  %v1059_v35 = vmul.f32 %v910_v59, %v1987_v34 }
 0x12e   : > { %v1040_v36 = vmul.f32 %v997_v60, %v1896_v12  ;;  %v1244_v26 = vrot.slane %v1238_v24, 7  ;;  %v1149_v38 = vrot.slane %v1148_v25, 2  ;;  %v1134_v39 = vadd.f32 %v1133_v29, %v1132_v5  ;;  %v1446_v45 = vpop.f32.mrb[16].mxu0 }
 0x12f   : > { %v1063_v41 = vmul.f32 %v914_v11, %v1989_v40  ;;  %v920_v42 = vpop.f32.mrb[16].mxu1  ;;  %v1128_v44 = vrot.slane %v1127_v30, 2  ;;  %v1156_v47 = vrot.slane %v1155_v33, 2  ;;  %v1055_v49 = vmul.f32 %v1443_v13, %v1894_v27  ;;  %v1017_v51 = vpop.f32.mrb[17].mxu0 }
 0x130   : > { %v1104_v48 = vadd.f32 %v1045_v20, %v1040_v36  ;;  %v922_v50 = vpop.f32.mrb[17].mxu1  ;;  %v1246_v52 = vsel %vm1245_vm1, %v1244_v26, %v1236_v46  ;;  %v1150_v16 = vadd.f32 %v1149_v38, %v1148_v25  ;;  %v1135_v21 = vrot.slane %v1134_v39, 2 }
 0x131   : > { %v1160_v53 = vadd.f32 %v1063_v41, %v1058_v17  ;;  %v1248_v54 = vsel %vm1247_vm2, %v1244_v26, %v1246_v52  ;;  %v1129_v55 = vadd.f32 %v1128_v44, %v1127_v30  ;;  %v1157_v56 = vadd.f32 %v1156_v47, %v1155_v33 }
 0x132   : > { %v1105_v10 = vrot.slane %v1104_v48, 4  ;;  %v1151_v57 = vrot.slane %v1150_v16, 1  ;;  %v1136_v58 = vadd.f32 %v1135_v21, %v1134_v39  ;;  %v1064_v60 = vmul.f32 %v916_v22, %v1991_v43  ;;  %v1449_v63 = vpop.f32.mrb[18].mxu0 }
 0x133   : > { %v1161_v59 = vrot.slane %v1160_v53, 4  ;;  %v926_v61 = vpop.f32.mrb[18].mxu1  ;;  %v1130_v0 = vrot.slane %v1129_v55, 1  ;;  %v1158_v28 = vrot.slane %v1157_v56, 1  ;;  %v1050_v46 = vmul.f32 %v1007_v23, %v1896_v12  ;;  %v1027_v6 = vpop.f32.mrb[19].mxu0 }
 0x134   : > { %v1106_v31 = vadd.f32 %v1105_v10, %v1104_v48  ;;  %v928_v1 = vpop.f32.mrb[19].mxu1  ;;  %v1152_v3 = vadd.f32 %v1151_v57, %v1150_v16  ;;  %v1137_v2 = vrot.slane %v1136_v58, 1  ;;  %v1167_v18 = vadd.f32 %v1064_v60, %v1059_v35 }
 0x135   : > { %v1162_v8 = vadd.f32 %v1161_v59, %v1160_v53  ;;  %v1131_v5 = vadd.f32 %v1130_v0, %v1129_v55  ;;  %v1159_v11 = vadd.f32 %v1158_v28, %v1157_v56  ;;  %v1139_v4 = vadd.f32 %v1055_v49, %v1050_v46 }
 0x136   : > { %v1107_v13 = vrot.slane %v1106_v31, 2  ;;  %v1138_v15 = vadd.f32 %v1137_v2, %v1136_v58  ;;  %v1168_v20 = vrot.slane %v1167_v18, 4  ;;  %v1254_v22 = vrot.slane %v1242_v37, 5 }
 0x137   : > { %v1163_v17 = vrot.slane %v1162_v8, 2  ;;  %v1240_v23 = vcombine.low %v1152_v3, %v1159_v11  ;;  %v1140_v24 = vrot.slane %v1139_v4, 4  ;;  %v1065_v25 = vmul.f32 %v1446_v45, %v1894_v27 }
 0x138   : > { %v1239_v29 = vcombine.low %v1131_v5, %v1138_v15  ;;  %v1169_v33 = vadd.f32 %v1168_v20, %v1167_v18  ;;  %v1068_v35 = vmul.f32 %v920_v42, %v1975_v62  ;;  %v1108_v26 = vadd.f32 %v1107_v13, %v1106_v31 }
 0x139   : > { %v1164_v30 = vadd.f32 %v1163_v17, %v1162_v8  ;;  %v1249_v36 = vrot.slane %v1240_v23, 6  ;;  %v1141_v38 = vadd.f32 %v1140_v24, %v1139_v4  ;;  %v1060_v39 = vmul.f32 %v1017_v51, %v1896_v12 }
 0x13a   : > { %v1259_v41 = vrot.slane %v1239_v29, 7  ;;  %v1170_v19 = vrot.slane %v1169_v33, 2  ;;  %v1073_v32 = vmul.f32 %v926_v61, %v1989_v40  ;;  %v1069_v47 = vmul.f32 %v922_v50, %v1987_v34 }
 0x13b   : > { %v1165_v44 = vrot.slane %v1164_v30, 1  ;;  %v1251_v37 = vsel %vm1250_vm3, %v1249_v36, %v1248_v54  ;;  %v1142_v45 = vrot.slane %v1141_v38, 2  ;;  %v1174_v48 = vadd.f32 %v1065_v25, %v1060_v39 }
 0x13c   : > { %v1260_v62 = vsel %vm1245_vm1, %v1259_v41, %v1237_v14  ;;  %v1171_v49 = vadd.f32 %v1170_v19, %v1169_v33  ;;  %v1195_v51 = vadd.f32 %v1073_v32, %v1068_v35  ;;  %v1075_v40 = vmul.f32 %v1449_v63, %v1894_v27 }
 0x13d   : > { %v1166_v42 = vadd.f32 %v1165_v44, %v1164_v30  ;;  %v1261_v52 = vsel %vm1247_vm2, %v1259_v41, %v1260_v62  ;;  %v1143_v16 = vadd.f32 %v1142_v45, %v1141_v38  ;;  %v1175_v21 = vrot.slane %v1174_v48, 4 }
 0x13e   : > { %v1172_v53 = vrot.slane %v1171_v49, 1  ;;  %v1196_v54 = vrot.slane %v1195_v51, 4  ;;  %v1074_v34 = vmul.f32 %v928_v1, %v1991_v43  ;;  %v1070_v50 = vmul.f32 %v1027_v6, %v1896_v12 }
 0x13f   : > { %v1109_v7 = vrot.slane %v1108_v26, 1  ;;  %v1144_v9 = vrot.slane %v1143_v16, 1  ;;  %v1176_v14 = vadd.f32 %v1175_v21, %v1174_v48  ;;  %v1253_v55 = vsel %vm1252_vm4, %v1249_v36, %v1251_v37 }
 0x140   : > { %v1173_v56 = vadd.f32 %v1172_v53, %v1171_v49  ;;  %v1197_v10 = vadd.f32 %v1196_v54, %v1195_v51  ;;  %v1202_v57 = vadd.f32 %v1074_v34, %v1069_v47  ;;  %v1209_v58 = vadd.f32 %v1075_v40, %v1070_v50 }
 0x141   : > { %v1145_v59 = vadd.f32 %v1144_v9, %v1143_v16  ;;  %v1177_v60 = vrot.slane %v1176_v14, 2  ;;  %v1256_v27 = vsel %vm1255_vm5, %v1254_v22, %v1253_v55  ;;  %v1110_v43 = vadd.f32 %v1109_v7, %v1108_v26 }
 0x142   : > { %v1241_v61 = vcombine.low %v1166_v42, %v1173_v56  ;;  %v1198_v63 = vrot.slane %v1197_v10, 2  ;;  %v1203_v0 = vrot.slane %v1202_v57, 4  ;;  %v1210_v28 = vrot.slane %v1209_v58, 4 }
 0x143   : > { %v1268_v31 = vrot.slane %v1145_v59, 7  ;;  %v1178_v12 = vadd.f32 %v1177_v60, %v1176_v14  ;;  %v1258_v46 = vsel %vm1257_vm6, %v1254_v22, %v1256_v27 }
 0x144   : > { %v1262_v1 = vrot.slane %v1241_v61, 6  ;;  %v1199_v6 = vadd.f32 %v1198_v63, %v1197_v10  ;;  %v1204_v3 = vadd.f32 %v1203_v0, %v1202_v57  ;;  %v1211_v2 = vadd.f32 %v1210_v28, %v1209_v58  ;;  %1280 = vst [vmem:[%s2063_s6] sm:$0xff] %v1258_v46 }
 0x145   : > { %v1269_v8 = vsel %vm1245_vm1, %v1268_v31, %v1110_v43  ;;  %v1179_v18 = vrot.slane %v1178_v12, 1 }
 0x146   : > { %v1263_v5 = vsel %vm1250_vm3, %v1262_v1, %v1261_v52  ;;  %v1270_v11 = vsel %vm1247_vm2, %v1268_v31, %v1269_v8  ;;  %v1200_v13 = vrot.slane %v1199_v6, 1  ;;  %v1205_v4 = vrot.slane %v1204_v3, 2 }
 0x147   : > { %v1180_v15 = vadd.f32 %v1179_v18, %v1178_v12  ;;  %v1212_v17 = vrot.slane %v1211_v2, 2  ;;  %v1264_v20 = vsel %vm1252_vm4, %v1262_v1, %v1263_v5 }
 0x148   : > { %v1206_v22 = vadd.f32 %v1205_v4, %v1204_v3  ;;  %v1201_v25 = vadd.f32 %v1200_v13, %v1199_v6 }
 0x149   : > { %v1271_v23 = vrot.slane %v1180_v15, 6  ;;  %v1213_v24 = vadd.f32 %v1212_v17, %v1211_v2 }
 0x14a   : > { %v1207_v29 = vrot.slane %v1206_v22, 1 }
 0x14b   : > { %v1272_v30 = vsel %vm1250_vm3, %v1271_v23, %v1270_v11  ;;  %v1214_v33 = vrot.slane %v1213_v24, 1 }
 0x14c   : > { %v1273_v35 = vsel %vm1252_vm4, %v1271_v23, %v1272_v30  ;;  %v1208_v36 = vadd.f32 %v1207_v29, %v1206_v22 }
 0x14d   : > { %v1215_v26 = vadd.f32 %v1214_v33, %v1213_v24 }
 0x14e   : > { %v1243_v38 = vcombine.low %v1201_v25, %v1208_v36 }
 0x14f   : > { %v1274_v39 = vrot.slane %v1215_v26, 5 }
 0x150   : > { %v1265_v41 = vrot.slane %v1243_v38, 5 }
 0x151   : > { %v1275_v44 = vsel %vm1255_vm5, %v1274_v39, %v1273_v35 }
 0x152   : > { %v1266_v19 = vsel %vm1255_vm5, %v1265_v41, %v1264_v20  ;;  %v1276_v32 = vsel %vm1257_vm6, %v1274_v39, %v1275_v44 }
 0x153   : > { %v1267_v37 = vsel %vm1257_vm6, %v1265_v41, %v1266_v19  ;;  %1282 = vst [vmem:[%s2063_s6 + $0x10] sm:$0xf] %v1276_v32 }
 0x154   : > { %1281 = vst [vmem:[%s2063_s6 + $0x8] sm:$0xff] %v1267_v37 }
 0x155   : > { %1540 = shalt.err (!%p1537_p5)
}
 0x156   : > { %s1541_s26 = scalar_lea.hbm %s2080_s18, 320  ;;  %s1545_s29 = scalar_lea.hbm %s2134_s2, 640 }
 0x157   : > { %p1542_p6 = scmp.ne.s32.totalorder %s2080_s18, %s1541_s26  ;;  %p1546_p10 = scmp.lt.u32.totalorder %s2080_s18, %s2134_s2 }
 0x158   : > { %p1547_p11 = scmp.lt.u32.totalorder %s1545_s29, %s1541_s26  ;;  %p1549_p13 = scmp.lt.u32.totalorder %s1541_s26, %s2080_s18 }
 0x159   : > { %p1543_p7 = pnand %p1542_p6, %p1664_p4 }
 0x15a   : > { %p1548_p12 = por %p1547_p11, %p1546_p10 }
 0x15b   : > { %p1544_p9 = pneg %p1543_p7 }
 0x15c   : > { %p1550_p0 = por %p1549_p13, %p1548_p12 }
 0x15e   : > { %p1551_p1 = pnand %p1550_p0, %p1544_p9 }
 0x160   : > { %1554 = shalt.err (!%p1551_p1)
}
 0x161   : > { %1471 = dma.vmem_to_hbm [thread:$0]  (%p1664_p4), %s2082_s8, 320, %s2080_s18, %s1284_s12  }
 0x162 PF: > { %p1477_p2 = scmp.ge.s32.totalorder %s1605_s14, 2  ;;  %s1312_s4 = sand.u32 1, %s1585_s9  }
 0x163   : > { %s1313_s5 = scalar_lea.sflag [#allocation3], %s1312_s4 }
 0x164   : > { %p1474_p3 = pnand %p1477_p2, %p1671_p8 }
 0x166   : > { %1580 = dma.done.wait (!%p1474_p3), %s1313_s5, 320  }
 0x167   : > { %1582 = vsyncadd (!%p1474_p3), %s1313_s5, 4294966976  ;;  %s15_s14 = sadd.s32 1, %s1605_s14   ;;  %s2137_s9 = smov %s1589_s10 }
 0x168   : > { %p12_p5 = scmp.ge.s32.totalorder %s15_s14, 4   ;;  %s2138_s10 = smov %s1593_s11 }
 0x169   : > { %s2139_s11 = smov %s1677_s22  ;;  %s2140_s12 = smov %s1601_s13 }
 0x16a   : > { %s2141_s13 = smov %s2143_s17  ;;  %14 = sbr.rel (!%p12_p5) target bundleno = 4 (0x4), region = 66 }
 0x171   :  { %1318 = vsyncpa [#allocation3], 1 }
 0x172   :  { %1320 = vsyncpa [#allocation3 + $0x1], 1 }

</bundles_post_ra>
